<compile_context>
chip_gen: v7x
topology: tpu7x:2x2x1
jax: 0.10.0
libtpu: 0.0.40
codegen_flags: <defaults>
</compile_context>

<pallas_src>
import functools

import jax
import jax.numpy as jnp
from jax.experimental import pallas as pl
from jax.experimental.pallas import tpu as pltpu

HIDDEN = 64      # logical hidden width (matches the PyTorch module)
HPAD = 128       # lane-dense padded hidden width
OPAD = 128       # lane-dense padded output width
TILE_B = 4096    # max batch tile (multiple of 16)


def _round_up(n, m):
    return ((n + m - 1) // m) * m


def _cdiv(a, b):
    return -(-a // b)


def qnetwork_kernel(x_ref, w1_ref, b1_ref, w2_ref, b2_ref, w3_ref, b3_ref, o_ref):
    # In-kernel f32 -> bf16 cast of the activations (VPU cast is free here).
    x = x_ref[...].astype(jnp.bfloat16)
    # Layer 1: (tb, S)bf16 @ (S, 128)bf16 -> f32 accumulate; bias + ReLU in f32.
    h1 = jnp.dot(x, w1_ref[...], preferred_element_type=jnp.float32)
    h1 = jnp.maximum(h1 + b1_ref[...], 0.0)
    # Layer 2: (tb, 128)bf16 @ (128, 128)bf16 -> f32.
    h2 = jnp.dot(h1.astype(jnp.bfloat16), w2_ref[...],
                 preferred_element_type=jnp.float32)
    h2 = jnp.maximum(h2 + b2_ref[...], 0.0)
    # Output layer: (tb, 128)bf16 @ (128, 128)bf16 -> f32; lane-dense bf16 store.
    out = jnp.dot(h2.astype(jnp.bfloat16), w3_ref[...],
                  preferred_element_type=jnp.float32)
    o_ref[...] = (out + b3_ref[...]).astype(o_ref.dtype)


def init_params(key, state_size, action_size):
    """PyTorch nn.Linear-style init (U[-1/sqrt(fan_in), +1/sqrt(fan_in)]), f32."""
    def linear(key, fan_in, fan_out):
        kw, kb = jax.random.split(key)
        bound = 1.0 / jnp.sqrt(jnp.float32(fan_in))
        w = jax.random.uniform(kw, (fan_in, fan_out), jnp.float32, -bound, bound)
        b = jax.random.uniform(kb, (1, fan_out), jnp.float32, -bound, bound)
        return w, b

    k1, k2, k3 = jax.random.split(key, 3)
    w1, b1 = linear(k1, state_size, HIDDEN)
    w2, b2 = linear(k2, HIDDEN, HIDDEN)
    w3, b3 = linear(k3, HIDDEN, action_size)
    return {"w1": w1, "b1": b1, "w2": w2, "b2": b2, "w3": w3, "b3": b3}


def prepare_device_params(params, action_size):
    """Zero-pad to lane-dense (128) widths and cast weights to bf16.

    Padded rows/cols and padded bias lanes are zero, so lanes [:action_size]
    of the kernel output match the unpadded result exactly (before the final
    bf16 rounding of the store).
    """
    S = params["w1"].shape[0]
    w1 = jnp.zeros((S, HPAD), jnp.float32).at[:, :HIDDEN].set(params["w1"])
    b1 = jnp.zeros((1, HPAD), jnp.float32).at[:, :HIDDEN].set(params["b1"][0])
    w2 = jnp.zeros((HPAD, HPAD), jnp.float32).at[:HIDDEN, :HIDDEN].set(params["w2"])
    b2 = jnp.zeros((1, HPAD), jnp.float32).at[:, :HIDDEN].set(params["b2"][0])
    w3 = jnp.zeros((HPAD, OPAD), jnp.float32).at[:HIDDEN, :action_size].set(params["w3"])
    b3 = jnp.zeros((1, OPAD), jnp.float32).at[:, :action_size].set(params["b3"][0])
    return {
        "w1": w1.astype(jnp.bfloat16), "b1": b1,
        "w2": w2.astype(jnp.bfloat16), "b2": b2,
        "w3": w3.astype(jnp.bfloat16), "b3": b3,
    }


@functools.partial(jax.jit, static_argnames=("action_size", "tile_b"))
def qnetwork_forward(x, dev_params, *, action_size, tile_b=TILE_B):
    """x: (B, state_size) f32. dev_params: output of prepare_device_params.

    Returns (B, action_size) f32 Q-values (same semantics as the PyTorch module,
    modulo bf16 weight/output quantization).
    """
    B, S = x.shape

    # --- adaptive batch tiling (tile must be a multiple of 16 for bf16 packing) ---
    tile_b = max(16, (int(tile_b) // 16) * 16)
    n_tiles = _cdiv(B, tile_b)
    tb = _round_up(_cdiv(B, n_tiles), 16)          # bounds padding waste to <16 rows/tile
    # v7x megacore: prefer >= 2 grid steps so the "parallel" axis feeds both TCs.
    if _cdiv(B, tb) < 2 and tb >= 32:
        tb = _round_up(_cdiv(tb, 2), 16)
    b_pad = _round_up(B, tb)
    grid = (b_pad // tb,)

    # x stays f32 (cast happens in-kernel); only pad the (small) batch remainder.
    xp = x if b_pad == B else jnp.pad(x, ((0, b_pad - B), (0, 0)))

    flops = 2 * b_pad * (S * HPAD + HPAD * HPAD + HPAD * OPAD)
    bytes_accessed = (
        b_pad * S * 4                                   # x (f32)
        + (S * HPAD + HPAD * HPAD + HPAD * OPAD) * 2    # weights (bf16)
        + (2 * HPAD + OPAD) * 4                         # biases (f32)
        + b_pad * OPAD * 2                              # output (bf16)
    )

    out = pl.pallas_call(
        qnetwork_kernel,
        out_shape=jax.ShapeDtypeStruct((b_pad, OPAD), jnp.bfloat16),
        grid_spec=pltpu.PrefetchScalarGridSpec(
            num_scalar_prefetch=0,
            grid=grid,
            in_specs=[
                pl.BlockSpec((tb, S), lambda i: (i, 0)),        # x: batch-tiled, f32
                pl.BlockSpec((S, HPAD), lambda i: (0, 0)),      # w1: VMEM-resident
                pl.BlockSpec((1, HPAD), lambda i: (0, 0)),      # b1
                pl.BlockSpec((HPAD, HPAD), lambda i: (0, 0)),   # w2
                pl.BlockSpec((1, HPAD), lambda i: (0, 0)),      # b2
                pl.BlockSpec((HPAD, OPAD), lambda i: (0, 0)),   # w3
                pl.BlockSpec((1, OPAD), lambda i: (0, 0)),      # b3
            ],
            out_specs=pl.BlockSpec((tb, OPAD), lambda i: (i, 0)),
        ),
        compiler_params=pltpu.CompilerParams(
            dimension_semantics=("parallel",),
        ),
        cost_estimate=pl.CostEstimate(
            flops=flops, transcendentals=0, bytes_accessed=bytes_accessed),
    )(xp, dev_params["w1"], dev_params["b1"], dev_params["w2"], dev_params["b2"],
      dev_params["w3"], dev_params["b3"])

    # Tiny post-pass: (B, action_size) slice + f32 cast (negligible bytes).
    return out[:B, :action_size].astype(jnp.float32)


def qnetwork_ref_device(x, dp, action_size):
    """Pure-JAX reference replicating the kernel's numeric path (bf16 MXU, f32 acc,
    bf16 output store)."""
    h = jnp.dot(x.astype(jnp.bfloat16), dp["w1"], preferred_element_type=jnp.float32)
    h = jnp.maximum(h + dp["b1"], 0.0)
    h = jnp.dot(h.astype(jnp.bfloat16), dp["w2"], preferred_element_type=jnp.float32)
    h = jnp.maximum(h + dp["b2"], 0.0)
    o = jnp.dot(h.astype(jnp.bfloat16), dp["w3"], preferred_element_type=jnp.float32)
    o = (o + dp["b3"]).astype(jnp.bfloat16)
    return o[:, :action_size].astype(jnp.float32)


def qnetwork_ref_f32(x, p):
    """Full-precision reference matching the original PyTorch module semantics."""
    h = jnp.maximum(x @ p["w1"] + p["b1"], 0.0)
    h = jnp.maximum(h @ p["w2"] + p["b2"], 0.0)
    return h @ p["w3"] + p["b3"]


if __name__ == "__main__":
    key = jax.random.PRNGKey(0)
    kp, kx1, kx2 = jax.random.split(key, 3)

    state_size = 8
    action_size = 4

    params = init_params(kp, state_size, action_size)
    dev_params = prepare_device_params(params, action_size)

    # Case 1: tiny batch (grid = 1 tile).
    x1 = jax.random.normal(kx1, (2, state_size), jnp.float32)
    out1 = jax.block_until_ready(qnetwork_forward(x1, dev_params, action_size=action_size))
    assert out1.shape == (2, action_size)

    # Case 2: non-multiple-of-16 batch exercising padding + a 2-step grid.
    x2 = jax.random.normal(kx2, (40, state_size), jnp.float32)
    out2 = jax.block_until_ready(qnetwork_forward(x2, dev_params, action_size=action_size))
    assert out2.shape == (40, action_size)

    for x, out in ((x1, out1), (x2, out2)):
        # Check against a reference using the same bf16 device params / math path
        # (tolerance ~ a couple of bf16 ulps on O(1) values).
        ref_dev = qnetwork_ref_device(x, dev_params, action_size)
        assert jnp.allclose(out, ref_dev, atol=2e-2, rtol=2e-2), \
            "mismatch vs device-path reference"
        # Loose semantic check against the original f32 module (bf16 quantization).
        ref_f32 = qnetwork_ref_f32(x, params)
        assert jnp.allclose(out, ref_f32, atol=1e-1, rtol=1e-1), \
            "mismatch vs f32 module semantics"

    print("KERNEL_OK")
</pallas_src>

<mosaic_0001>
module attributes {stable_mosaic.version = 11 : i64} {
  func.func @qnetwork_kernel(%arg0: i32, %arg1: memref<16x8xf32, #tpu.memory_space<vmem>>, %arg2: memref<8x128xbf16, #tpu.memory_space<vmem>>, %arg3: memref<1x128xf32, #tpu.memory_space<vmem>>, %arg4: memref<128x128xbf16, #tpu.memory_space<vmem>>, %arg5: memref<1x128xf32, #tpu.memory_space<vmem>>, %arg6: memref<128x128xbf16, #tpu.memory_space<vmem>>, %arg7: memref<1x128xf32, #tpu.memory_space<vmem>>, %arg8: memref<16x128xbf16, #tpu.memory_space<vmem>>) attributes {dimension_semantics = [#tpu.dimension_semantics<parallel>], iteration_bounds = array<i64: 1>, scalar_prefetch = 0 : i64, scratch_operands = 0 : i64, tpu.core_type = #tpu.core_type<tc>, window_params = [{transform_indices = @transform_0, window_bounds = array<i64: 16, 8>}, {pipeline_mode = #tpu.pipeline_mode<synchronous>, transform_indices = @transform_1, window_bounds = array<i64: 8, 128>}, {pipeline_mode = #tpu.pipeline_mode<synchronous>, transform_indices = @transform_2, window_bounds = array<i64: 1, 128>}, {pipeline_mode = #tpu.pipeline_mode<synchronous>, transform_indices = @transform_3, window_bounds = array<i64: 128, 128>}, {pipeline_mode = #tpu.pipeline_mode<synchronous>, transform_indices = @transform_4, window_bounds = array<i64: 1, 128>}, {pipeline_mode = #tpu.pipeline_mode<synchronous>, transform_indices = @transform_5, window_bounds = array<i64: 128, 128>}, {pipeline_mode = #tpu.pipeline_mode<synchronous>, transform_indices = @transform_6, window_bounds = array<i64: 1, 128>}, {transform_indices = @transform_7, window_bounds = array<i64: 16, 128>}]} {
    %c0 = arith.constant 0 : index
    %c0_0 = arith.constant 0 : index
    %0 = vector.load %arg1[%c0, %c0_0] : memref<16x8xf32, #tpu.memory_space<vmem>>, vector<16x8xf32>
    %1 = arith.truncf %0 : vector<16x8xf32> to vector<16x8xbf16>
    %c0_1 = arith.constant 0 : index
    %c0_2 = arith.constant 0 : index
    %2 = vector.load %arg2[%c0_1, %c0_2] : memref<8x128xbf16, #tpu.memory_space<vmem>>, vector<8x128xbf16>
    %cst = arith.constant dense<0.000000e+00> : vector<16x128xf32>
    %3 = tpu.matmul %1, %2, %cst {dimension_numbers = #tpu.dot_dimension_numbers<[1], [0], [0], [1], [0, 0, 1, 1], [], []>} : vector<16x8xbf16>, vector<8x128xbf16>, vector<16x128xf32> -> vector<16x128xf32>
    %c0_3 = arith.constant 0 : index
    %c0_4 = arith.constant 0 : index
    %4 = vector.load %arg3[%c0_3, %c0_4] : memref<1x128xf32, #tpu.memory_space<vmem>>, vector<1x128xf32>
    %5 = vector.broadcast %4 : vector<1x128xf32> to vector<16x128xf32>
    %6 = arith.addf %3, %5 : vector<16x128xf32>
    %cst_5 = arith.constant 0.000000e+00 : f32
    %7 = vector.broadcast %cst_5 : f32 to vector<16x128xf32>
    %8 = arith.maximumf %6, %7 : vector<16x128xf32>
    %9 = arith.truncf %8 : vector<16x128xf32> to vector<16x128xbf16>
    %c0_6 = arith.constant 0 : index
    %c0_7 = arith.constant 0 : index
    %10 = vector.load %arg4[%c0_6, %c0_7] : memref<128x128xbf16, #tpu.memory_space<vmem>>, vector<128x128xbf16>
    %cst_8 = arith.constant dense<0.000000e+00> : vector<16x128xf32>
    %11 = tpu.matmul %9, %10, %cst_8 {dimension_numbers = #tpu.dot_dimension_numbers<[1], [0], [0], [1], [0, 0, 1, 1], [], []>} : vector<16x128xbf16>, vector<128x128xbf16>, vector<16x128xf32> -> vector<16x128xf32>
    %c0_9 = arith.constant 0 : index
    %c0_10 = arith.constant 0 : index
    %12 = vector.load %arg5[%c0_9, %c0_10] : memref<1x128xf32, #tpu.memory_space<vmem>>, vector<1x128xf32>
    %13 = vector.broadcast %12 : vector<1x128xf32> to vector<16x128xf32>
    %14 = arith.addf %11, %13 : vector<16x128xf32>
    %cst_11 = arith.constant 0.000000e+00 : f32
    %15 = vector.broadcast %cst_11 : f32 to vector<16x128xf32>
    %16 = arith.maximumf %14, %15 : vector<16x128xf32>
    %17 = arith.truncf %16 : vector<16x128xf32> to vector<16x128xbf16>
    %c0_12 = arith.constant 0 : index
    %c0_13 = arith.constant 0 : index
    %18 = vector.load %arg6[%c0_12, %c0_13] : memref<128x128xbf16, #tpu.memory_space<vmem>>, vector<128x128xbf16>
    %cst_14 = arith.constant dense<0.000000e+00> : vector<16x128xf32>
    %19 = tpu.matmul %17, %18, %cst_14 {dimension_numbers = #tpu.dot_dimension_numbers<[1], [0], [0], [1], [0, 0, 1, 1], [], []>} : vector<16x128xbf16>, vector<128x128xbf16>, vector<16x128xf32> -> vector<16x128xf32>
    %c0_15 = arith.constant 0 : index
    %c0_16 = arith.constant 0 : index
    %20 = vector.load %arg7[%c0_15, %c0_16] : memref<1x128xf32, #tpu.memory_space<vmem>>, vector<1x128xf32>
    %21 = vector.broadcast %20 : vector<1x128xf32> to vector<16x128xf32>
    %22 = arith.addf %19, %21 : vector<16x128xf32>
    %23 = arith.truncf %22 : vector<16x128xf32> to vector<16x128xbf16>
    %c0_17 = arith.constant 0 : index
    %c0_18 = arith.constant 0 : index
    %24 = vector.load %arg8[%c0_17, %c0_18] : memref<16x128xbf16, #tpu.memory_space<vmem>>, vector<16x128xbf16>
    tpu.vector_store %arg8[%c0_17, %c0_18], %23 {strides = array<i32>} : memref<16x128xbf16, #tpu.memory_space<vmem>>, vector<16x128xbf16>,
    return
  }
  func.func @transform_0(%arg0: i32) -> (i32, i32) {
    %c0_i32 = arith.constant 0 : i32
    %c0_i32_0 = arith.constant 0 : i32
    return %arg0, %c0_i32 : i32, i32
  }
  func.func @transform_1(%arg0: i32) -> (i32, i32) {
    %c0_i32 = arith.constant 0 : i32
    %c0_i32_0 = arith.constant 0 : i32
    %c0_i32_1 = arith.constant 0 : i32
    return %c0_i32, %c0_i32_0 : i32, i32
  }
  func.func @transform_2(%arg0: i32) -> (i32, i32) {
    %c0_i32 = arith.constant 0 : i32
    %c0_i32_0 = arith.constant 0 : i32
    %c0_i32_1 = arith.constant 0 : i32
    return %c0_i32, %c0_i32_0 : i32, i32
  }
  func.func @transform_3(%arg0: i32) -> (i32, i32) {
    %c0_i32 = arith.constant 0 : i32
    %c0_i32_0 = arith.constant 0 : i32
    %c0_i32_1 = arith.constant 0 : i32
    return %c0_i32, %c0_i32_0 : i32, i32
  }
  func.func @transform_4(%arg0: i32) -> (i32, i32) {
    %c0_i32 = arith.constant 0 : i32
    %c0_i32_0 = arith.constant 0 : i32
    %c0_i32_1 = arith.constant 0 : i32
    return %c0_i32, %c0_i32_0 : i32, i32
  }
  func.func @transform_5(%arg0: i32) -> (i32, i32) {
    %c0_i32 = arith.constant 0 : i32
    %c0_i32_0 = arith.constant 0 : i32
    %c0_i32_1 = arith.constant 0 : i32
    return %c0_i32, %c0_i32_0 : i32, i32
  }
  func.func @transform_6(%arg0: i32) -> (i32, i32) {
    %c0_i32 = arith.constant 0 : i32
    %c0_i32_0 = arith.constant 0 : i32
    %c0_i32_1 = arith.constant 0 : i32
    return %c0_i32, %c0_i32_0 : i32, i32
  }
  func.func @transform_7(%arg0: i32) -> (i32, i32) {
    %c0_i32 = arith.constant 0 : i32
    %c0_i32_0 = arith.constant 0 : i32
    return %arg0, %c0_i32 : i32, i32
  }
}

</mosaic_0001>

<bundles_post_ra>
// kernel: qnetwork_forward.1
= control target key start
LH: loop header
LB: loop body
LE: loop exit
PB: predicated region body
PF: predicated region fallthrough
CT: control target
= control target key end

     0   :  { %12 = vsyncpa [#allocation3], 0  ;;  %s640_s0 = inlined_call_operand.vmem [shape: f32[16,8], index: 0, kind: input, shape index: {}]   ;;  %s641_s1 = inlined_call_operand.vmem [shape: bf16[8,128], index: 1, kind: input, shape index: {}]   ;;  %s642_s2 = inlined_call_operand.vmem [shape: f32[1,128], index: 2, kind: input, shape index: {}]   ;;  %s643_s3 = inlined_call_operand.hbm [shape: bf16[128,128], index: 3, kind: input, shape index: {}]   ;;  %s644_s4 = inlined_call_operand.vmem [shape: f32[1,128], index: 4, kind: input, shape index: {}]   ;;  %s645_s5 = inlined_call_operand.hbm [shape: bf16[128,128], index: 5, kind: input, shape index: {}]   ;;  %s646_s6 = inlined_call_operand.vmem [shape: f32[1,128], index: 6, kind: input, shape index: {}]   ;;  %s647_s7 = inlined_call_operand.vmem [shape: bf16[16,128], index: 7, kind: output, shape index: {}]  }
   0x1   :  { %13 = vsyncpa [#allocation5], 0  ;;  %s526_s24 = smov [#allocation2]   ;;  %s478_s28 = scalar_lea.hbm %s643_s3, 1024 }
   0x2   :  { %s25_s25 = sshll.u32 %s526_s24, 4  ;;  %p479_p0 = scmp.ne.s32.totalorder %s643_s3, %s478_s28  ;;  %s26_s25 = int_to_ptr.vmem [resolvable:$true] %s25_s25 }
   0x3   :  { %p482_p1 = scmp.lt.u32.totalorder %s478_s28, %s643_s3 }
   0x5   :  { %p484_p2 = pnand %p482_p1, %p479_p0 }
   0x7   :  { %487 = shalt.err (!%p484_p2)
}
   0x8   :  { %s488_s10 = scalar_lea.vmem %s26_s25, 1024  ;;  %p493_p4 = scmp.lt.s32.totalorder %s26_s25, %s26_s25 }
   0x9   :  { %p489_p3 = scmp.ne.s32.totalorder %s26_s25, %s488_s10  ;;  %p494_p5 = scmp.lt.s32.totalorder %s488_s10, %s488_s10 }
   0xb   :  { %p495_p6 = por %p494_p5, %p493_p4 }
   0xd   :  { %p496_p7 = pnand %p495_p6, %p489_p3 }
   0xf   :  { %499 = shalt.err (!%p496_p7)
}
  0x10   :  { %s527_s11 = smov 64   ;;  %s528_s12 = smov 4  }
  0x11   :  { %31 = dma.hbm_to_vmem [thread:$0]  %s643_s3, 1024, %s26_s25, [#allocation3], %s527_s11, %s527_s11, %s528_s12  }
  0x12   :  { %s529_s15 = smov [#allocation4]   ;;  %s500_s19 = scalar_lea.hbm %s645_s5, 1024 }
  0x13   :  { %s39_s16 = sshll.u32 %s529_s15, 4  ;;  %p501_p8 = scmp.ne.s32.totalorder %s645_s5, %s500_s19  ;;  %s40_s16 = int_to_ptr.vmem [resolvable:$true] %s39_s16 }
  0x14   :  { %p504_p9 = scmp.lt.u32.totalorder %s500_s19, %s645_s5 }
  0x16   :  { %p506_p10 = pnand %p504_p9, %p501_p8 }
  0x18   :  { %509 = shalt.err (!%p506_p10)
}
  0x19   :  { %s510_s24 = scalar_lea.vmem %s40_s16, 1024  ;;  %p515_p12 = scmp.lt.s32.totalorder %s40_s16, %s40_s16 }
  0x1a   :  { %p511_p11 = scmp.ne.s32.totalorder %s40_s16, %s510_s24  ;;  %p516_p13 = scmp.lt.s32.totalorder %s510_s24, %s510_s24 }
  0x1c   :  { %p517_p0 = por %p516_p13, %p515_p12 }
  0x1e   :  { %p518_p1 = pnand %p517_p0, %p511_p11 }
  0x20   :  { %521 = shalt.err (!%p518_p1)
}
  0x21   :  { %45 = dma.hbm_to_vmem [thread:$0]  %s645_s5, 1024, %s40_s16, [#allocation5], %s527_s11, %s527_s11, %s528_s12  }
  0x22   :  { %522 = dma.done.wait [#allocation3], 1024  }
  0x23   :  { %523 = vsyncadd [#allocation3], 4294966272 }
  0x24   :  { %524 = dma.done.wait [#allocation5], 1024  }
  0x25   :  { %525 = vsyncadd [#allocation5], 4294966272  ;;  %v530_v0 = vmov 0.0   ;;  %vm531_vm0 = vmmov 0   ;;  %vm70_vm1 = vcmask 1043456   ;;  %v55_v2 = vld [vmem:[%s640_s0] sm:$0xff] }
  0x26   :  { %410 = vmatprep.subr.bf16.mxu0 %v530_v0  ;;  %412 = vmatprep.mubr.msk.bf16.mxu0 %vm531_vm0, %v530_v0  ;;  %v58_v1 = vld [vmem:[%s641_s1] sm:$0xf]  ;;  %v56_v3 = vld [vmem:[%s640_s0 + $0x8] sm:$0xff]  ;;  %vm66_vm2 = vcmask 64512   ;;  %v464_v8 = vld [vmem:[#allocation2 + $0x10] sm:$0xff]  }
  0x27   :  { %416 = vmatprep.subr.bf16.mxu1 %v530_v0  ;;  %432 = vmatprep.mubr.msk.bf16.mxu1 %vm531_vm0, %v530_v0  ;;  %v72_v4 = vsel %vm70_vm1, %v58_v1, 0  ;;  %v57_v5 = vpack.c.bf16 %v56_v3, %v55_v2  ;;  %v462_v6 = vld [vmem:[#allocation2] sm:$0xff]   ;;  %v463_v7 = vld [vmem:[#allocation2 + $0x8] sm:$0xff]   ;;  %v465_v9 = vld [vmem:[#allocation2 + $0x18] sm:$0xff]  }
  0x28   :  { %411 = vmatpush3.bf16.msra.mxu0 %v72_v4  ;;  %417 = vmatpush3.bf16.msra.mxu1 %v462_v6  ;;  %v466_v10 = vld [vmem:[#allocation2 + $0x20] sm:$0xff]   ;;  %v467_v11 = vld [vmem:[#allocation2 + $0x28] sm:$0xff]   ;;  %v468_v12 = vld [vmem:[#allocation2 + $0x30] sm:$0xff]  }
  0x29   :  { %436 = vmatprep.subr.bf16.mxu0 %v530_v0  ;;  %418 = vmatprep.subr.bf16.mxu1 %v530_v0  ;;  %v469_v13 = vld [vmem:[#allocation2 + $0x38] sm:$0xff]   ;;  %v470_v14 = vld [vmem:[#allocation4] sm:$0xff]   ;;  %v471_v15 = vld [vmem:[#allocation4 + $0x8] sm:$0xff]  }
  0x2a   :  { %v472_v16 = vld [vmem:[#allocation4 + $0x10] sm:$0xff]   ;;  %v473_v17 = vld [vmem:[#allocation4 + $0x18] sm:$0xff]   ;;  %v474_v18 = vld [vmem:[#allocation4 + $0x20] sm:$0xff]  }
  0x2b   :  { %413 = vmatmul.mubr.msk.bf16.vlgmr.msra.gmra.mrb[0].mxu0 %vm66_vm2, %v57_v5  ;;  %v475_v19 = vld [vmem:[#allocation4 + $0x28] sm:$0xff]   ;;  %v361_v20 = vld [vmem:[%s642_s2] ss:$0 sm:$0xff]  ;;  %v476_v30 = vld [vmem:[#allocation4 + $0x30] sm:$0xff]  }
  0x2c   :  { %452 = vmatprep.mubr.msk.bf16.mxu0 %vm531_vm0, %v530_v0  ;;  %419 = vmatpush3.bf16.msra.mxu1 %v463_v7  ;;  %v477_v31 = vld [vmem:[#allocation4 + $0x38] sm:$0xff]   ;;  %v363_v32 = vld [vmem:[%s644_s4] ss:$0 sm:$0xff] }
  0x2d   :  { %420 = vmatprep.subr.bf16.mxu1 %v530_v0  ;;  %437 = vmatpush3.bf16.msra.mxu0 %v470_v14  ;;  %v372_v42 = vld [vmem:[%s646_s6] ss:$0 sm:$0xff] }
  0x2e   :  { %438 = vmatprep.subr.bf16.mxu0 %v530_v0 }
  0x30   :  { %421 = vmatpush3.bf16.msra.mxu1 %v464_v8 }
  0x31   :  { %422 = vmatprep.subr.bf16.mxu1 %v530_v0  ;;  %439 = vmatpush3.bf16.msra.mxu0 %v471_v15 }
  0x32   :  { %440 = vmatprep.subr.bf16.mxu0 %v530_v0 }
  0x34   :  { %423 = vmatpush3.bf16.msra.mxu1 %v465_v9 }
  0x35   :  { %424 = vmatprep.subr.bf16.mxu1 %v530_v0  ;;  %441 = vmatpush3.bf16.msra.mxu0 %v472_v16 }
  0x36   :  { %442 = vmatprep.subr.bf16.mxu0 %v530_v0 }
  0x38   :  { %425 = vmatpush3.bf16.msra.mxu1 %v466_v10 }
  0x39   :  { %426 = vmatprep.subr.bf16.mxu1 %v530_v0  ;;  %443 = vmatpush3.bf16.msra.mxu0 %v473_v17 }
  0x3a   :  { %444 = vmatprep.subr.bf16.mxu0 %v530_v0 }
  0x3c   :  { %427 = vmatpush3.bf16.msra.mxu1 %v467_v11 }
  0x3d   :  { %428 = vmatprep.subr.bf16.mxu1 %v530_v0  ;;  %445 = vmatpush3.bf16.msra.mxu0 %v474_v18 }
  0x3e   :  { %446 = vmatprep.subr.bf16.mxu0 %v530_v0 }
  0x40   :  { %429 = vmatpush3.bf16.msra.mxu1 %v468_v12 }
  0x41   :  { %430 = vmatprep.subr.bf16.mxu1 %v530_v0  ;;  %447 = vmatpush3.bf16.msra.mxu0 %v475_v19 }
  0x42   :  { %448 = vmatprep.subr.bf16.mxu0 %v530_v0 }
  0x44   :  { %431 = vmatpush3.bf16.msra.mxu1 %v469_v13 }
  0x45   :  { %449 = vmatpush3.bf16.msra.mxu0 %v476_v30 }
  0x46   :  { %450 = vmatprep.subr.bf16.mxu0 %v530_v0 }
  0x49   :  { %451 = vmatpush3.bf16.msra.mxu0 %v477_v31 }
  0xfe   :  { %v108_v21 = vpop.f32.mrb[0].mxu0 }
  0xff   :  { %v109_v22 = vadd.f32 %v361_v20, %v108_v21  ;;  %v414_v23 = vpop.f32.mrb[1].mxu0 }
 0x100   :  { %v111_v24 = vpop.f32.mrb[2].mxu0 }
 0x101   :  { %v112_v25 = vadd.f32 %v361_v20, %v111_v24  ;;  %v415_v26 = vpop.f32.mrb[3].mxu0  ;;  %v115_v27 = vmax.f32 %v109_v22, 0.0 }
 0x103   :  { %v116_v28 = vmax.f32 %v112_v25, 0.0 }
 0x105   :  { %v117_v29 = vpack.c.bf16 %v116_v28, %v115_v27 }
 0x107   :  { %433 = vmatmul.mubr.bf16.vlgmr.msra.gmra.mrb[0].mxu1 %v117_v29 }
 0x1da   :  { %v223_v33 = vpop.f32.mrb[0].mxu1 }
 0x1db   :  { %v224_v34 = vadd.f32 %v363_v32, %v223_v33  ;;  %v434_v35 = vpop.f32.mrb[1].mxu1 }
 0x1dc   :  { %v226_v36 = vpop.f32.mrb[2].mxu1 }
 0x1dd   :  { %v227_v37 = vadd.f32 %v363_v32, %v226_v36  ;;  %v435_v38 = vpop.f32.mrb[3].mxu1  ;;  %v230_v39 = vmax.f32 %v224_v34, 0.0 }
 0x1df   :  { %v231_v40 = vmax.f32 %v227_v37, 0.0 }
 0x1e1   :  { %v232_v41 = vpack.c.bf16 %v231_v40, %v230_v39 }
 0x1e3   :  { %453 = vmatmul.mubr.bf16.vlgmr.msra.gmra.mrb[4].mxu0 %v232_v41 }
 0x2b6   :  { %v338_v43 = vpop.f32.mrb[4].mxu0 }
 0x2b7   :  { %v454_v44 = vpop.f32.mrb[5].mxu0  ;;  %v339_v46 = vadd.f32 %v372_v42, %v338_v43 }
 0x2b8   :  { %v341_v45 = vpop.f32.mrb[6].mxu0 }
 0x2b9   :  { %v342_v47 = vadd.f32 %v372_v42, %v341_v45  ;;  %v455_v48 = vpop.f32.mrb[7].mxu0 }
 0x2bb   :  { %v388_v49 = vpack.c.bf16 %v342_v47, %v339_v46 }
 0x2bd   :  { %389 = vst [vmem:[%s647_s7] sm:$0xff] %v388_v49  }
 0x2be   :  { %359 = vsyncpa [#allocation3], 1 }
 0x2bf   :  { %360 = vsyncpa [#allocation5], 1 }

</bundles_post_ra>
